<compile_context>
chip_gen: v7x
topology: tpu7x:2x2x1
jax: 0.10.0
libtpu: 0.0.40
codegen_flags: <defaults>
</compile_context>

<pallas_src>
import jax
import jax.numpy as jnp
from jax.experimental import pallas as pl
from jax.experimental.pallas import tpu as pltpu


def _round_up(x: int, m: int) -> int:
    return (x + m - 1) // m * m


def actor_kernel(x_ref, w1_ref, b1_ref, w2_ref, b2_ref, w3_ref, b3_ref, o_ref):
    # fc1 -> ReLU   (bf16 MXU inputs, f32 accumulation; K=state_dim is handled
    # by Mosaic's lane masking, padded lanes contribute zero to the dot).
    x = x_ref[...].astype(jnp.bfloat16)
    h1 = jnp.dot(x, w1_ref[...], preferred_element_type=jnp.float32)
    h1 = jnp.maximum(h1 + b1_ref[...], 0.0)

    # fc2 -> ReLU
    h2 = jnp.dot(h1.astype(jnp.bfloat16), w2_ref[...],
                 preferred_element_type=jnp.float32)
    h2 = jnp.maximum(h2 + b2_ref[...], 0.0)

    # fc3 -> tanh   (f32 weights; narrow N=action_dim output -> tiny writeback)
    h3 = jnp.dot(h2, w3_ref[...], preferred_element_type=jnp.float32)
    o_ref[...] = jnp.tanh(h3 + b3_ref[...]).astype(o_ref.dtype)


def prepare_params(w1, b1, w2, b2, w3, b3):
    """Cast fc1/fc2 weights to bf16 (MXU input dtype); keep fc3 and biases f32.

    Weights are stored [in, out] so the kernel computes y = x @ W + b, which
    equals PyTorch's x @ W_pt.T + b.  No padding is needed: non-128 dims are
    passed as full-extent blocks and Mosaic masks them internally.
    """
    return (
        w1.astype(jnp.bfloat16), b1.reshape(1, -1).astype(jnp.float32),
        w2.astype(jnp.bfloat16), b2.reshape(1, -1).astype(jnp.float32),
        w3.astype(jnp.float32),  b3.reshape(1, -1).astype(jnp.float32),
    )


def _choose_tb(batch: int, block_b: int) -> int:
    """Batch tile: >=2 grid steps when the batch allows it (v7x has 2 TCs),
    rounded to 16 sublanes (bf16 packing), capped at block_b (per-step
    overhead amortization on v6e/v7x without blowing up VMEM)."""
    if batch <= 16:
        return 16
    half = (batch + 1) // 2
    return min(block_b, _round_up(half, 16))


def actor_forward(state, params, *, block_b=512):
    """state: [B, state_dim] f32.  params: output of prepare_params."""
    w1, b1, w2, b2, w3, b3 = params
    B, state_dim = state.shape
    action_dim = w3.shape[1]

    TB = _choose_tb(B, block_b)
    B_pad = _round_up(B, TB)
    # Pad batch rows only (zeros) when B isn't a tile multiple; no K/N padding.
    x = state if B_pad == B else jnp.pad(state, ((0, B_pad - B), (0, 0)))

    const = lambda a: pl.BlockSpec(a.shape, lambda i: (0, 0))

    out = pl.pallas_call(
        actor_kernel,
        out_shape=jax.ShapeDtypeStruct((B_pad, action_dim), jnp.float32),
        grid=(B_pad // TB,),
        in_specs=[
            pl.BlockSpec((TB, state_dim), lambda i: (i, 0)),  # streaming state
            const(w1), const(b1),                             # VMEM-resident
            const(w2), const(b2),
            const(w3), const(b3),
        ],
        out_specs=pl.BlockSpec((TB, action_dim), lambda i: (i, 0)),
        compiler_params=pltpu.CompilerParams(
            dimension_semantics=("parallel",),
        ),
    )(x, w1, b1, w2, b2, w3, b3)

    return out if B_pad == B else out[:B]


def init_params(key, state_dim, hidden_units, action_dim):
    """Deterministic init mirroring the PyTorch module's reset_params().

    PyTorch weight is [out, in]; hidden_init uses weight.size(0) == out_features,
    so lim = 1/sqrt(out_features) for fc1/fc2, and (-3e-3, 3e-3) for fc3.
    Biases keep nn.Linear default: U(-1/sqrt(in_features), 1/sqrt(in_features)).
    We store weights as [in, out] for the kernel (f32; prepare_params casts).
    """
    h0, h1 = hidden_units
    ks = jax.random.split(key, 6)

    def unif(k, shape, lim):
        return jax.random.uniform(k, shape, jnp.float32, minval=-lim, maxval=lim)

    w1 = unif(ks[0], (state_dim, h0), 1.0 / jnp.sqrt(h0))
    b1 = unif(ks[1], (1, h0), 1.0 / jnp.sqrt(state_dim))
    w2 = unif(ks[2], (h0, h1), 1.0 / jnp.sqrt(h1))
    b2 = unif(ks[3], (1, h1), 1.0 / jnp.sqrt(h0))
    w3 = unif(ks[4], (h1, action_dim), 3e-3)
    b3 = unif(ks[5], (1, action_dim), 1.0 / jnp.sqrt(h1))
    return w1, b1, w2, b2, w3, b3


if __name__ == "__main__":
    # Reacher-like dims; hidden_units matches the module's default [256, 256].
    batch = 64
    state_dim = 33
    hidden_units = [256, 256]
    action_dim = 4

    key = jax.random.PRNGKey(0)
    k_state, k_params = jax.random.split(key)

    state = jax.random.normal(k_state, (batch, state_dim), jnp.float32)
    f32_params = init_params(k_params, state_dim, hidden_units, action_dim)
    params = prepare_params(*f32_params)

    out = actor_forward(state, params)
    jax.block_until_ready(out)

    # Sanity: tanh output must lie in [-1, 1] and have the right shape.
    assert out.shape == (batch, action_dim)
    assert bool(jnp.all(jnp.abs(out) <= 1.0))

    # Cross-check against a plain-JAX f32 reference (bf16 matmul inputs in the
    # kernel for fc1/fc2 => allow a few e-2 tolerance on the tanh output).
    w1, b1, w2, b2, w3, b3 = f32_params
    ref = jnp.maximum(state @ w1 + b1, 0.0)
    ref = jnp.maximum(ref @ w2 + b2, 0.0)
    ref = jnp.tanh(ref @ w3 + b3)
    assert bool(jnp.allclose(out, ref, atol=5e-2)), float(jnp.max(jnp.abs(out - ref)))

    # Also exercise the ragged small-batch / batch-padding path (TB=16).
    out_small = actor_forward(state[:7], params)
    jax.block_until_ready(out_small)
    assert out_small.shape == (7, action_dim)
    assert bool(jnp.allclose(out_small, ref[:7], atol=5e-2))

    print("KERNEL_OK")
</pallas_src>

<mosaic_0001>
module attributes {stable_mosaic.version = 11 : i64} {
  func.func @actor_kernel(%arg0: i32, %arg1: memref<32x33xf32, #tpu.memory_space<vmem>>, %arg2: memref<33x256xbf16, #tpu.memory_space<vmem>>, %arg3: memref<1x256xf32, #tpu.memory_space<vmem>>, %arg4: memref<256x256xbf16, #tpu.memory_space<vmem>>, %arg5: memref<1x256xf32, #tpu.memory_space<vmem>>, %arg6: memref<256x4xf32, #tpu.memory_space<vmem>>, %arg7: memref<1x4xf32, #tpu.memory_space<vmem>>, %arg8: memref<32x4xf32, #tpu.memory_space<vmem>>) attributes {dimension_semantics = [#tpu.dimension_semantics<parallel>], iteration_bounds = array<i64: 2>, scalar_prefetch = 0 : i64, scratch_operands = 0 : i64, tpu.core_type = #tpu.core_type<tc>, window_params = [{transform_indices = @transform_0, window_bounds = array<i64: 32, 33>}, {pipeline_mode = #tpu.pipeline_mode<synchronous>, transform_indices = @transform_1, window_bounds = array<i64: 33, 256>}, {pipeline_mode = #tpu.pipeline_mode<synchronous>, transform_indices = @transform_2, window_bounds = array<i64: 1, 256>}, {pipeline_mode = #tpu.pipeline_mode<synchronous>, transform_indices = @transform_3, window_bounds = array<i64: 256, 256>}, {pipeline_mode = #tpu.pipeline_mode<synchronous>, transform_indices = @transform_4, window_bounds = array<i64: 1, 256>}, {pipeline_mode = #tpu.pipeline_mode<synchronous>, transform_indices = @transform_5, window_bounds = array<i64: 256, 4>}, {pipeline_mode = #tpu.pipeline_mode<synchronous>, transform_indices = @transform_6, window_bounds = array<i64: 1, 4>}, {transform_indices = @transform_7, window_bounds = array<i64: 32, 4>}]} {
    %c0 = arith.constant 0 : index
    %c0_0 = arith.constant 0 : index
    %0 = vector.load %arg1[%c0, %c0_0] : memref<32x33xf32, #tpu.memory_space<vmem>>, vector<32x33xf32>
    %1 = arith.truncf %0 : vector<32x33xf32> to vector<32x33xbf16>
    %c0_1 = arith.constant 0 : index
    %c0_2 = arith.constant 0 : index
    %2 = vector.load %arg2[%c0_1, %c0_2] : memref<33x256xbf16, #tpu.memory_space<vmem>>, vector<33x256xbf16>
    %cst = arith.constant dense<0.000000e+00> : vector<32x256xf32>
    %3 = tpu.matmul %1, %2, %cst {dimension_numbers = #tpu.dot_dimension_numbers<[1], [0], [0], [1], [0, 0, 1, 1], [], []>} : vector<32x33xbf16>, vector<33x256xbf16>, vector<32x256xf32> -> vector<32x256xf32>
    %c0_3 = arith.constant 0 : index
    %c0_4 = arith.constant 0 : index
    %4 = vector.load %arg3[%c0_3, %c0_4] : memref<1x256xf32, #tpu.memory_space<vmem>>, vector<1x256xf32>
    %5 = vector.broadcast %4 : vector<1x256xf32> to vector<32x256xf32>
    %6 = arith.addf %3, %5 : vector<32x256xf32>
    %cst_5 = arith.constant 0.000000e+00 : f32
    %7 = vector.broadcast %cst_5 : f32 to vector<32x256xf32>
    %8 = arith.maximumf %6, %7 : vector<32x256xf32>
    %9 = arith.truncf %8 : vector<32x256xf32> to vector<32x256xbf16>
    %c0_6 = arith.constant 0 : index
    %c0_7 = arith.constant 0 : index
    %10 = vector.load %arg4[%c0_6, %c0_7] : memref<256x256xbf16, #tpu.memory_space<vmem>>, vector<256x256xbf16>
    %cst_8 = arith.constant dense<0.000000e+00> : vector<32x256xf32>
    %11 = tpu.matmul %9, %10, %cst_8 {dimension_numbers = #tpu.dot_dimension_numbers<[1], [0], [0], [1], [0, 0, 1, 1], [], []>} : vector<32x256xbf16>, vector<256x256xbf16>, vector<32x256xf32> -> vector<32x256xf32>
    %c0_9 = arith.constant 0 : index
    %c0_10 = arith.constant 0 : index
    %12 = vector.load %arg5[%c0_9, %c0_10] : memref<1x256xf32, #tpu.memory_space<vmem>>, vector<1x256xf32>
    %13 = vector.broadcast %12 : vector<1x256xf32> to vector<32x256xf32>
    %14 = arith.addf %11, %13 : vector<32x256xf32>
    %cst_11 = arith.constant 0.000000e+00 : f32
    %15 = vector.broadcast %cst_11 : f32 to vector<32x256xf32>
    %16 = arith.maximumf %14, %15 : vector<32x256xf32>
    %c0_12 = arith.constant 0 : index
    %c0_13 = arith.constant 0 : index
    %17 = vector.load %arg6[%c0_12, %c0_13] : memref<256x4xf32, #tpu.memory_space<vmem>>, vector<256x4xf32>
    %cst_14 = arith.constant dense<0.000000e+00> : vector<32x4xf32>
    %18 = tpu.matmul %16, %17, %cst_14 {dimension_numbers = #tpu.dot_dimension_numbers<[1], [0], [0], [1], [0, 0, 1, 1], [], []>} : vector<32x256xf32>, vector<256x4xf32>, vector<32x4xf32> -> vector<32x4xf32>
    %c0_15 = arith.constant 0 : index
    %c0_16 = arith.constant 0 : index
    %19 = vector.load %arg7[%c0_15, %c0_16] : memref<1x4xf32, #tpu.memory_space<vmem>>, vector<1x4xf32>
    %20 = vector.broadcast %19 : vector<1x4xf32> to vector<32x4xf32>
    %21 = arith.addf %18, %20 : vector<32x4xf32>
    %22 = math.tanh %21 : vector<32x4xf32>
    %c0_17 = arith.constant 0 : index
    %c0_18 = arith.constant 0 : index
    %23 = vector.load %arg8[%c0_17, %c0_18] : memref<32x4xf32, #tpu.memory_space<vmem>>, vector<32x4xf32>
    tpu.vector_store %arg8[%c0_17, %c0_18], %22 {strides = array<i32>} : memref<32x4xf32, #tpu.memory_space<vmem>>, vector<32x4xf32>,
    return
  }
  func.func @transform_0(%arg0: i32) -> (i32, i32) {
    %c0_i32 = arith.constant 0 : i32
    %c0_i32_0 = arith.constant 0 : i32
    return %arg0, %c0_i32 : i32, i32
  }
  func.func @transform_1(%arg0: i32) -> (i32, i32) {
    %c0_i32 = arith.constant 0 : i32
    %c0_i32_0 = arith.constant 0 : i32
    %c0_i32_1 = arith.constant 0 : i32
    return %c0_i32, %c0_i32_0 : i32, i32
  }
  func.func @transform_2(%arg0: i32) -> (i32, i32) {
    %c0_i32 = arith.constant 0 : i32
    %c0_i32_0 = arith.constant 0 : i32
    %c0_i32_1 = arith.constant 0 : i32
    return %c0_i32, %c0_i32_0 : i32, i32
  }
  func.func @transform_3(%arg0: i32) -> (i32, i32) {
    %c0_i32 = arith.constant 0 : i32
    %c0_i32_0 = arith.constant 0 : i32
    %c0_i32_1 = arith.constant 0 : i32
    return %c0_i32, %c0_i32_0 : i32, i32
  }
  func.func @transform_4(%arg0: i32) -> (i32, i32) {
    %c0_i32 = arith.constant 0 : i32
    %c0_i32_0 = arith.constant 0 : i32
    %c0_i32_1 = arith.constant 0 : i32
    return %c0_i32, %c0_i32_0 : i32, i32
  }
  func.func @transform_5(%arg0: i32) -> (i32, i32) {
    %c0_i32 = arith.constant 0 : i32
    %c0_i32_0 = arith.constant 0 : i32
    %c0_i32_1 = arith.constant 0 : i32
    return %c0_i32, %c0_i32_0 : i32, i32
  }
  func.func @transform_6(%arg0: i32) -> (i32, i32) {
    %c0_i32 = arith.constant 0 : i32
    %c0_i32_0 = arith.constant 0 : i32
    %c0_i32_1 = arith.constant 0 : i32
    return %c0_i32, %c0_i32_0 : i32, i32
  }
  func.func @transform_7(%arg0: i32) -> (i32, i32) {
    %c0_i32 = arith.constant 0 : i32
    %c0_i32_0 = arith.constant 0 : i32
    return %arg0, %c0_i32 : i32, i32
  }
}

</mosaic_0001>

<bundles_post_ra>
// kernel: tpu_custom_call.1
= control target key start
LH: loop header
LB: loop body
LE: loop exit
PB: predicated region body
PF: predicated region fallthrough
CT: control target
= control target key end

     0   :  { %s1116_s24 = smov 0   ;;  %s1358_s0 = inlined_call_operand.vmem [shape: f32[64,33], index: 0, kind: input, shape index: {}]   ;;  %s1359_s1 = inlined_call_operand.vmem [shape: bf16[33,256], index: 1, kind: input, shape index: {}]   ;;  %s1360_s2 = inlined_call_operand.vmem [shape: f32[1,256], index: 2, kind: input, shape index: {}]   ;;  %s1361_s3 = inlined_call_operand.vmem [shape: bf16[256,256], index: 3, kind: input, shape index: {}]   ;;  %s1362_s4 = inlined_call_operand.vmem [shape: f32[1,256], index: 4, kind: input, shape index: {}]   ;;  %s1363_s5 = inlined_call_operand.vmem [shape: f32[256,4], index: 5, kind: input, shape index: {}]   ;;  %s1364_s6 = inlined_call_operand.vmem [shape: f32[1,4], index: 6, kind: input, shape index: {}]   ;;  %s1365_s7 = inlined_call_operand.vmem [shape: f32[64,4], index: 7, kind: output, shape index: {}]  }
   0x1 LB: > { %s866_s25 = sadd.s32 4294967295, %s1073_s24   ;;  %p870_p0 = scmp.ge.s32.totalorder %s1073_s24, 1  ;;  %s1073_s24 = sphi %s1116_s24, %s17_s24  }
   0x2   : > { %p238_p1 = scmp.lt.s32.totalorder %s1073_s24, 3 }
   0x4   : > { %p239_p2 = pnand %p870_p0, %p238_p1 }
   0x5   : > { %v1003_v0 = vld [vmem:[%s1359_s1 + $0x4] ss:$8 sps:$4 sm:$0xff] (!%p239_p2)   ;;  %vm338_vm0 = vcmask (!%p239_p2), 1040384   ;;  %v1005_v1 = vld [vmem:[%s1359_s1] ss:$8 sps:$4 sm:$0xff] (!%p239_p2)   ;;  %v1075_v2 = vmov (!%p239_p2), 0  }
   0x6   : > { %242 = sbr.rel (%p239_p2) target bundleno = 700 (0x2bc), region = 48  ;;  %v340_v3 = vsel (!%p239_p2), %vm338_vm0, 65535, %v1075_v2  ;;  %379 = vmatprep.mubr.bf16.mxu0 (!%p239_p2), %v1075_v2  ;;  %s871_s30 = sshll.u32 (!%p239_p2), %s866_s25, 2  ;;  %347 = vmatprep.subr.bf16.mxu0 (!%p239_p2), %v1003_v0  ;;  %v1006_v4 = vld [vmem:[%s1359_s1 + $0x14] ss:$8 sps:$4 sm:$0xff] (!%p239_p2)   ;;  %vm331_vm1 = vcmask (!%p239_p2), 269312  }
   0x7   : > { %v1008_v5 = vld [vmem:[%s1359_s1 + $0x10] ss:$8 sps:$4 sm:$0xff] (!%p239_p2)   ;;  %v293_v6 = vld [vmem:[%s1359_s1 + $0x20] sm:$0x11] (!%p239_p2)  ;;  %348 = vmatpush1.bf16.msra.mxu0 (!%p239_p2), %v1005_v1  ;;  %p271_p3 = scmp.lt.s32.totalorder (!%p239_p2), %s871_s30, 7  ;;  %v694_v50 = vld [vmem:[%s1363_s5 + $0x88] sm:$0xff] (!%p239_p2) }
   0x8   : > { %v880_v7 = vcombine.high (!%p239_p2), %v293_v6, %v293_v6  ;;  %v879_v8 = vcombine.low (!%p239_p2), %v293_v6, %v293_v6  ;;  %v1011_v9 = vld [vmem:[%s1361_s3 + $0x4] ss:$8 sps:$4 sm:$0xff] (!%p239_p2)   ;;  %349 = vmatprep.subr.bf16.mxu0 (!%p239_p2), %v1006_v4  ;;  %v1013_v10 = vld [vmem:[%s1361_s3] ss:$8 sps:$4 sm:$0xff] (!%p239_p2)   ;;  %v1014_v12 = vld [vmem:[%s1361_s3 + $0x14] ss:$8 sps:$4 sm:$0xff] (!%p239_p2)  }
   0x9   : > { %616 = vmatprep.subr.bf16.mxu1 (!%p239_p2), %v1011_v9  ;;  %v1016_v13 = vld [vmem:[%s1361_s3 + $0x10] ss:$8 sps:$4 sm:$0xff] (!%p239_p2)   ;;  %v1017_v15 = vld [vmem:[%s1361_s3 + $0x24] ss:$8 sps:$4 sm:$0xff] (!%p239_p2)   ;;  %v1019_v19 = vld [vmem:[%s1361_s3 + $0x20] ss:$8 sps:$4 sm:$0xff] (!%p239_p2)  }
   0xa   : > { %v345_v11 = vand.u32 (!%p239_p2), %v880_v7, %v340_v3  ;;  %617 = vmatpush1.bf16.msra.mxu1 (!%p239_p2), %v1013_v10  ;;  %v342_v14 = vand.u32 (!%p239_p2), %v879_v8, %v340_v3  ;;  %v1020_v20 = vld [vmem:[%s1361_s3 + $0x34] ss:$8 sps:$4 sm:$0xff] (!%p239_p2)   ;;  %v1022_v21 = vld [vmem:[%s1361_s3 + $0x30] ss:$8 sps:$4 sm:$0xff] (!%p239_p2)   ;;  %v1023_v24 = vld [vmem:[%s1361_s3 + $0x44] ss:$8 sps:$4 sm:$0xff] (!%p239_p2)  }
   0xb   : > { %350 = vmatpush1.bf16.msra.mxu0 (!%p239_p2), %v1008_v5  ;;  %618 = vmatprep.subr.bf16.mxu1 (!%p239_p2), %v1014_v12  ;;  %v1025_v26 = vld [vmem:[%s1361_s3 + $0x40] ss:$8 sps:$4 sm:$0xff] (!%p239_p2)   ;;  %v1026_v27 = vld [vmem:[%s1361_s3 + $0x54] ss:$8 sps:$4 sm:$0xff] (!%p239_p2)   ;;  %v1028_v28 = vld [vmem:[%s1361_s3 + $0x50] ss:$8 sps:$4 sm:$0xff] (!%p239_p2)  }
   0xc   : > { %351 = vmatprep.subr.bf16.mxu0 (!%p239_p2), %v345_v11  ;;  %v1029_v29 = vld [vmem:[%s1361_s3 + $0x64] ss:$8 sps:$4 sm:$0xff] (!%p239_p2)   ;;  %v1031_v30 = vld [vmem:[%s1361_s3 + $0x60] ss:$8 sps:$4 sm:$0xff] (!%p239_p2)   ;;  %v1032_v31 = vld [vmem:[%s1361_s3 + $0x74] ss:$8 sps:$4 sm:$0xff] (!%p239_p2)  }
   0xd   : > { %s1367_s30 = smov (!%p271_p3, %s871_s30), 7  ;;  %v1034_v32 = vld [vmem:[%s1361_s3 + $0x70] ss:$8 sps:$4 sm:$0xff]   ;;  %v1035_v33 = vld [vmem:[%s1361_s3 + $0x84] ss:$8 sps:$4 sm:$0xff]   ;;  %vm805_vm2 = vcmask 31744  }
   0xe   : > { %s872_s22 = sshll.u32 %s1367_s30, 3  ;;  %619 = vmatpush1.bf16.msra.mxu1 %v1016_v13  ;;  %v1037_v34 = vld [vmem:[%s1361_s3 + $0x80] ss:$8 sps:$4 sm:$0xff]   ;;  %v1038_v35 = vld [vmem:[%s1361_s3 + $0x94] ss:$8 sps:$4 sm:$0xff]  }
   0xf   : > { %s274_s28 = scalar_lea.vmem %s1358_s0, %s872_s22  ;;  %352 = vmatpush1.bf16.msra.mxu0 %v342_v14  ;;  %620 = vmatprep.subr.bf16.mxu1 %v1017_v15  ;;  %v1040_v36 = vld [vmem:[%s1361_s3 + $0x90] ss:$8 sps:$4 sm:$0xff]   ;;  %v1041_v37 = vld [vmem:[%s1361_s3 + $0xa4] ss:$8 sps:$4 sm:$0xff]   ;;  %v1043_v38 = vld [vmem:[%s1361_s3 + $0xa0] ss:$8 sps:$4 sm:$0xff]   ;;  %s280_s13 = scalar_lea.vmem %s1365_s7, %s872_s22 }
  0x10   : > { %v283_v16 = vld [vmem:[%s274_s28] sm:$0xff]  ;;  %v284_v17 = vld [vmem:[%s274_s28 + $0x8] sm:$0xff]  ;;  %v285_v22 = vld [vmem:[%s274_s28 + $0x10] sm:$0xff] }
  0x11   : > { %v287_v18 = vpack.c.bf16 %v284_v17, %v283_v16  ;;  %v286_v23 = vld [vmem:[%s274_s28 + $0x18] sm:$0xff]  ;;  %v1047_v41 = vld [vmem:[%s1361_s3 + $0xc4] ss:$8 sps:$4 sm:$0xff]   ;;  %v1049_v42 = vld [vmem:[%s1361_s3 + $0xc0] ss:$8 sps:$4 sm:$0xff]  }
  0x12   : > { %621 = vmatpush1.bf16.msra.mxu1 %v1019_v19  ;;  %v288_v25 = vpack.c.bf16 %v286_v23, %v285_v22  ;;  %v1044_v39 = vld [vmem:[%s1361_s3 + $0xb4] ss:$8 sps:$4 sm:$0xff]   ;;  %v1046_v40 = vld [vmem:[%s1361_s3 + $0xb0] ss:$8 sps:$4 sm:$0xff]   ;;  %v1053_v45 = vld [vmem:[%s1361_s3 + $0xe4] ss:$8 sps:$4 sm:$0xff]  }
  0x13   : > { %881 = vmatmul.mubr.msk.bf16.vlgmr.msra.gmra.mrb[0].mxu0 %vm331_vm1, %v287_v18  ;;  %622 = vmatprep.subr.bf16.mxu1 %v1020_v20  ;;  %v1050_v43 = vld [vmem:[%s1361_s3 + $0xd4] ss:$8 sps:$4 sm:$0xff]   ;;  %v1052_v44 = vld [vmem:[%s1361_s3 + $0xd0] ss:$8 sps:$4 sm:$0xff]   ;;  %v1055_v46 = vld [vmem:[%s1361_s3 + $0xe0] ss:$8 sps:$4 sm:$0xff]  }
  0x14   : > { %389 = vmatprep.mubr.bf16.mxu0 %v1075_v2  ;;  %v1056_v47 = vld [vmem:[%s1361_s3 + $0xf4] ss:$8 sps:$4 sm:$0xff]   ;;  %v1058_v48 = vld [vmem:[%s1361_s3 + $0xf0] ss:$8 sps:$4 sm:$0xff]   ;;  %v693_v49 = vld [vmem:[%s1363_s5 + $0x80] sm:$0xff] }
  0x15   : > { %v677_v51 = vld [vmem:[%s1363_s5] sm:$0xff]  ;;  %v962_v52 = vpack.c.bf16 %v694_v50, %v693_v49  ;;  %v678_v53 = vld [vmem:[%s1363_s5 + $0x8] sm:$0xff]  ;;  %v695_v54 = vld [vmem:[%s1363_s5 + $0x90] sm:$0xff] }
  0x16   : > { %623 = vmatpush1.bf16.msra.mxu1 %v1022_v21  ;;  %v696_v55 = vld [vmem:[%s1363_s5 + $0x98] sm:$0xff]  ;;  %v964_v56 = vpack.c.bf16 %v678_v53, %v677_v51  ;;  %v679_v58 = vld [vmem:[%s1363_s5 + $0x10] sm:$0xff]  ;;  %v697_v60 = vld [vmem:[%s1363_s5 + $0xa0] sm:$0xff] }
  0x17   : > { %624 = vmatprep.subr.bf16.mxu1 %v1023_v24  ;;  %v966_v57 = vpack.c.bf16 %v696_v55, %v695_v54  ;;  %v680_v59 = vld [vmem:[%s1363_s5 + $0x18] sm:$0xff]  ;;  %963 = vmatprep.subr.bf16.mxu0 %v962_v52  ;;  %v698_v61 = vld [vmem:[%s1363_s5 + $0xa8] sm:$0xff]  ;;  %v681_v0 = vld [vmem:[%s1363_s5 + $0x20] sm:$0xff]  ;;  %v296_v24 = vlaneseq }
  0x18   : > { %965 = vmatpush3.bf16.msra.mxu0 %v964_v56  ;;  %v968_v62 = vpack.c.bf16 %v680_v59, %v679_v58  ;;  %v970_v63 = vpack.c.bf16 %v698_v61, %v697_v60  ;;  %v682_v1 = vld [vmem:[%s1363_s5 + $0x28] sm:$0xff]  ;;  %v699_v2 = vld [vmem:[%s1363_s5 + $0xb0] sm:$0xff]  ;;  %v700_v3 = vld [vmem:[%s1363_s5 + $0xb8] sm:$0xff] }
  0x19   : > { %967 = vmatprep.subr.bf16.mxu0 %v966_v57  ;;  %v972_v4 = vpack.c.bf16 %v682_v1, %v681_v0  ;;  %v974_v5 = vpack.c.bf16 %v700_v3, %v699_v2  ;;  %v683_v6 = vld [vmem:[%s1363_s5 + $0x30] sm:$0xff]  ;;  %v684_v7 = vld [vmem:[%s1363_s5 + $0x38] sm:$0xff]  ;;  %v701_v8 = vld [vmem:[%s1363_s5 + $0xc0] sm:$0xff] }
  0x1a   : > { %625 = vmatpush1.bf16.msra.mxu1 %v1025_v26  ;;  %v702_v9 = vld [vmem:[%s1363_s5 + $0xc8] sm:$0xff]  ;;  %v976_v10 = vpack.c.bf16 %v684_v7, %v683_v6  ;;  %v685_v12 = vld [vmem:[%s1363_s5 + $0x40] sm:$0xff]  ;;  %v703_v14 = vld [vmem:[%s1363_s5 + $0xd0] sm:$0xff] }
  0x1b   : > { %882 = vmatmul.mubr.msk.bf16.gmra.mrb[4].mxu0 %vm331_vm1, %v288_v25  ;;  %626 = vmatprep.subr.bf16.mxu1 %v1026_v27  ;;  %v978_v11 = vpack.c.bf16 %v702_v9, %v701_v8  ;;  %v686_v13 = vld [vmem:[%s1363_s5 + $0x48] sm:$0xff]  ;;  %v704_v15 = vld [vmem:[%s1363_s5 + $0xd8] sm:$0xff]  ;;  %v687_v18 = vld [vmem:[%s1363_s5 + $0x50] sm:$0xff]  ;;  %v297_v25 = vshrl.u32 %v296_v24, 7 }
  0x1c   : > { %969 = vmatpush3.bf16.msra.mxu0 %v968_v62  ;;  %v980_v16 = vpack.c.bf16 %v686_v13, %v685_v12  ;;  %v982_v17 = vpack.c.bf16 %v704_v15, %v703_v14  ;;  %v688_v19 = vld [vmem:[%s1363_s5 + $0x58] sm:$0xff]  ;;  %v705_v20 = vld [vmem:[%s1363_s5 + $0xe0] sm:$0xff]  ;;  %v706_v21 = vld [vmem:[%s1363_s5 + $0xe8] sm:$0xff] }
  0x1d   : > { %971 = vmatprep.subr.bf16.mxu0 %v970_v63  ;;  %v984_v22 = vpack.c.bf16 %v688_v19, %v687_v18  ;;  %v986_v23 = vpack.c.bf16 %v706_v21, %v705_v20  ;;  %v298_v26 = vsub.s32 0, %v297_v25  ;;  %v294_v27 = vld [vmem:[%s1360_s2] sm:$0x3]  ;;  %v690_v60 = vld [vmem:[%s1363_s5 + $0x68] sm:$0xff]  ;;  %v707_v62 = vld [vmem:[%s1363_s5 + $0xf0] sm:$0xff] }
  0x1e   : > { %627 = vmatpush1.bf16.msra.mxu1 %v1028_v28  ;;  %v302_v28 = vsub.s32 1, %v297_v25  ;;  %v689_v59 = vld [vmem:[%s1363_s5 + $0x60] sm:$0xff]  ;;  %v708_v63 = vld [vmem:[%s1363_s5 + $0xf8] sm:$0xff]  ;;  %v691_v1 = vld [vmem:[%s1363_s5 + $0x70] sm:$0xff] }
  0x1f   : > { %628 = vmatprep.subr.bf16.mxu1 %v1029_v29  ;;  %v299_v29 = vrot.slane %v294_v27, %v298_v26  ;;  %v988_v61 = vpack.c.bf16 %v690_v60, %v689_v59  ;;  %v990_v0 = vpack.c.bf16 %v708_v63, %v707_v62  ;;  %v692_v2 = vld [vmem:[%s1363_s5 + $0x78] sm:$0xff] }
  0x20   : > { %973 = vmatpush3.bf16.msra.mxu0 %v972_v4  ;;  %v992_v3 = vpack.c.bf16 %v692_v2, %v691_v1  ;;  %v444_v4 = vld [vmem:[%s1362_s4] sm:$0x3] }
  0x21   : > { %975 = vmatprep.subr.bf16.mxu0 %v974_v5  ;;  %v449_v5 = vrot.slane %v444_v4, %v298_v26  ;;  %v453_v6 = vrot.slane %v444_v4, %v302_v28 }
  0x22   : > { %629 = vmatpush1.bf16.msra.mxu1 %v1031_v30  ;;  %v303_v30 = vrot.slane %v294_v27, %v302_v28 }
  0x23   : > { %630 = vmatprep.subr.bf16.mxu1 %v1032_v31 }
  0x24   : > { %977 = vmatpush3.bf16.msra.mxu0 %v976_v10 }
  0x25   : > { %979 = vmatprep.subr.bf16.mxu0 %v978_v11 }
  0x26   : > { %631 = vmatpush1.bf16.msra.mxu1 %v1034_v32 }
  0x27   : > { %632 = vmatprep.subr.bf16.mxu1 %v1035_v33 }
  0x28   : > { %981 = vmatpush3.bf16.msra.mxu0 %v980_v16 }
  0x29   : > { %983 = vmatprep.subr.bf16.mxu0 %v982_v17 }
  0x2a   : > { %633 = vmatpush1.bf16.msra.mxu1 %v1037_v34 }
  0x2b   : > { %634 = vmatprep.subr.bf16.mxu1 %v1038_v35 }
  0x2c   : > { %985 = vmatpush3.bf16.msra.mxu0 %v984_v22 }
  0x2d   : > { %987 = vmatprep.subr.bf16.mxu0 %v986_v23 }
  0x2e   : > { %635 = vmatpush1.bf16.msra.mxu1 %v1040_v36 }
  0x2f   : > { %636 = vmatprep.subr.bf16.mxu1 %v1041_v37 }
  0x30   : > { %989 = vmatpush3.bf16.msra.mxu0 %v988_v61 }
  0x31   : > { %991 = vmatprep.subr.bf16.mxu0 %v990_v0 }
  0x32   : > { %637 = vmatpush1.bf16.msra.mxu1 %v1043_v38 }
  0x33   : > { %638 = vmatprep.subr.bf16.mxu1 %v1044_v39 }
  0x34   : > { %993 = vmatpush3.bf16.msra.mxu0 %v992_v3 }
  0x36   : > { %639 = vmatpush1.bf16.msra.mxu1 %v1046_v40 }
  0x37   : > { %640 = vmatprep.subr.bf16.mxu1 %v1047_v41 }
  0x3a   : > { %641 = vmatpush1.bf16.msra.mxu1 %v1049_v42 }
  0x3b   : > { %642 = vmatprep.subr.bf16.mxu1 %v1050_v43 }
  0x3e   : > { %643 = vmatpush1.bf16.msra.mxu1 %v1052_v44 }
  0x3f   : > { %644 = vmatprep.subr.bf16.mxu1 %v1053_v45 }
  0x42   : > { %645 = vmatpush1.bf16.msra.mxu1 %v1055_v46 }
  0x43   : > { %646 = vmatprep.subr.bf16.mxu1 %v1056_v47 }
  0x46   : > { %647 = vmatpush1.bf16.msra.mxu1 %v1058_v48 }
  0xe6   : > { %v381_v31 = vpop.f32.mrb[0].mxu0 }
  0xe7   : > { %v382_v32 = vadd.f32 %v381_v31, %v299_v29  ;;  %v383_v33 = vpop.f32.mrb[1].mxu0 }
  0xe8   : > { %v384_v34 = vadd.f32 %v383_v33, %v303_v30  ;;  %v385_v35 = vpop.f32.mrb[2].mxu0 }
  0xe9   : > { %v386_v36 = vadd.f32 %v385_v35, %v299_v29  ;;  %v387_v37 = vpop.f32.mrb[3].mxu0  ;;  %v400_v39 = vmax.f32 %v382_v32, 0.0  ;;  %v915_v32 = vld [vmem:[%s1364_s6] ss:$0 sm:$0xff] }
  0xea   : > { %v388_v38 = vadd.f32 %v387_v37, %v303_v30  ;;  %v401_v41 = vmax.f32 %v384_v34, 0.0 }
  0xeb   : > { %v402_v40 = vmax.f32 %v386_v36, 0.0 }
  0xec   : > { %v403_v42 = vmax.f32 %v388_v38, 0.0 }
  0xed   : > { %v408_v43 = vpack.c.bf16 %v402_v40, %v400_v39 }
  0xee   : > { %v391_v44 = vpop.f32.mrb[4].mxu0  ;;  %v409_v45 = vpack.c.bf16 %v403_v42, %v401_v41 }
  0xef   : > { %v392_v46 = vadd.f32 %v391_v44, %v299_v29  ;;  %v393_v47 = vpop.f32.mrb[5].mxu0 }
  0xf0   : > { %v394_v48 = vadd.f32 %v393_v47, %v303_v30  ;;  %v395_v49 = vpop.f32.mrb[6].mxu0  ;;  %648 = vmatprep.mubr.bf16.mxu1 %v409_v45 }
  0xf1   : > { %v396_v50 = vadd.f32 %v395_v49, %v299_v29  ;;  %v397_v51 = vpop.f32.mrb[7].mxu0  ;;  %649 = vmatmul.mubr.bf16.vlgmr.msra.gmra.mrb[0].mxu1 %v408_v43  ;;  %v404_v53 = vmax.f32 %v392_v46, 0.0 }
  0xf2   : > { %v398_v52 = vadd.f32 %v397_v51, %v303_v30  ;;  %v405_v55 = vmax.f32 %v394_v48, 0.0 }
  0xf3   : > { %v406_v54 = vmax.f32 %v396_v50, 0.0 }
  0xf4   : > { %v407_v56 = vmax.f32 %v398_v52, 0.0 }
  0xf5   : > { %v410_v57 = vpack.c.bf16 %v406_v54, %v404_v53 }
  0xf6   : > { %v411_v58 = vpack.c.bf16 %v407_v56, %v405_v55 }
  0xf8   : > { %658 = vmatprep.mubr.bf16.mxu1 %v411_v58 }
  0xf9   : > { %659 = vmatmul.mubr.bf16.gmra.mrb[4].mxu1 %v410_v57 }
 0x1c4   : > { %v650_v7 = vpop.f32.mrb[0].mxu1 }
 0x1c5   : > { %v651_v8 = vadd.f32 %v650_v7, %v449_v5  ;;  %v652_v9 = vpop.f32.mrb[1].mxu1 }
 0x1c6   : > { %v653_v10 = vadd.f32 %v652_v9, %v453_v6  ;;  %v654_v11 = vpop.f32.mrb[2].mxu1 }
 0x1c7   : > { %v656_v12 = vpop.f32.mrb[3].mxu1  ;;  %v669_v15 = vmax.f32 %v651_v8, 0.0  ;;  %v655_v16 = vadd.f32 %v654_v11, %v449_v5 }
 0x1c8   : > { %v670_v13 = vmax.f32 %v653_v10, 0.0  ;;  %v657_v14 = vadd.f32 %v656_v12, %v453_v6 }
 0x1c9   : > { %v671_v19 = vmax.f32 %v655_v16, 0.0 }
 0x1ca   : > { %v672_v17 = vmax.f32 %v657_v14, 0.0  ;;  %780 = vmatprep.mubr.f32.mxu0 %v670_v13 }
 0x1cb   : > { %781 = vmatmul.mubr.f32.vlgmr.msra.gmra.mrb[8].mxu0 %v669_v15 }
 0x1cc   : > { %v660_v18 = vpop.f32.mrb[4].mxu1  ;;  %785 = vmatprep.mubr.f32.mxu0 %v672_v17 }
 0x1cd   : > { %v661_v20 = vadd.f32 %v660_v18, %v449_v5  ;;  %v662_v21 = vpop.f32.mrb[5].mxu1 }
 0x1ce   : > { %v663_v22 = vadd.f32 %v662_v21, %v453_v6  ;;  %v664_v23 = vpop.f32.mrb[6].mxu1 }
 0x1cf   : > { %v666_v24 = vpop.f32.mrb[7].mxu1  ;;  %786 = vmatmul.mubr.f32.gmra.mrb[10].mxu0 %v671_v19  ;;  %v673_v27 = vmax.f32 %v661_v20, 0.0  ;;  %v665_v28 = vadd.f32 %v664_v23, %v449_v5 }
 0x1d0   : > { %v674_v25 = vmax.f32 %v663_v22, 0.0  ;;  %v667_v26 = vadd.f32 %v666_v24, %v453_v6 }
 0x1d1   : > { %v675_v30 = vmax.f32 %v665_v28, 0.0 }
 0x1d2   : > { %v676_v29 = vmax.f32 %v667_v26, 0.0  ;;  %790 = vmatprep.mubr.f32.mxu0 %v674_v25 }
 0x1d3   : > { %791 = vmatmul.mubr.f32.gmra.mrb[12].mxu0 %v673_v27 }
 0x1d4   : > { %795 = vmatprep.mubr.f32.mxu0 %v676_v29 }
 0x1d7   : > { %796 = vmatmul.mubr.f32.gmra.mrb[14].mxu0 %v675_v30 }
 0x29e   : > { %v950_v31 = vpop.f32.mrb[8].mxu0 }
 0x29f   : > { %v951_v33 = vpop.f32.mrb[9].mxu0 }
 0x2a0   : > { %v952_v34 = vadd.f32 %v951_v33, %v950_v31 }
 0x2a2   : > { %v783_v35 = vadd.f32 %v952_v34, %v915_v32  ;;  %v953_v36 = vpop.f32.mrb[10].mxu0 }
 0x2a3   : > { %v954_v37 = vpop.f32.mrb[11].mxu0 }
 0x2a4   : > { %1059 = vtanh.f32 %v783_v35  ;;  %v955_v38 = vadd.f32 %v954_v37, %v953_v36 }
 0x2a6   : > { %v788_v39 = vadd.f32 %v955_v38, %v915_v32  ;;  %v956_v40 = vpop.f32.mrb[12].mxu0 }
 0x2a7   : > { %v957_v41 = vpop.f32.mrb[13].mxu0 }
 0x2a8   : > { %1061 = vtanh.f32 %v788_v39  ;;  %v958_v42 = vadd.f32 %v957_v41, %v956_v40 }
 0x2aa   : > { %v793_v43 = vadd.f32 %v958_v42, %v915_v32  ;;  %v959_v44 = vpop.f32.mrb[14].mxu0 }
 0x2ab   : > { %v960_v45 = vpop.f32.mrb[15].mxu0 }
 0x2ac   : > { %1063 = vtanh.f32 %v793_v43  ;;  %v961_v46 = vadd.f32 %v960_v45, %v959_v44 }
 0x2ae   : > { %v1060_v47 = vpop.eup %1059  ;;  %v798_v48 = vadd.f32 %v961_v46, %v915_v32 }
 0x2af   : > { %806 = vst.msk [vmem:[%s280_s13] sm:$0xff] %vm805_vm2, %v1060_v47 }
 0x2b0   : > { %1065 = vtanh.f32 %v798_v48 }
 0x2b2   : > { %v1062_v49 = vpop.eup %1061 }
 0x2b3   : > { %807 = vst.msk [vmem:[%s280_s13 + $0x8] sm:$0xff] %vm805_vm2, %v1062_v49 }
 0x2b6   : > { %v1064_v50 = vpop.eup %1063 }
 0x2b7   : > { %808 = vst.msk [vmem:[%s280_s13 + $0x10] sm:$0xff] %vm805_vm2, %v1064_v50 }
 0x2ba   : > { %v1066_v51 = vpop.eup %1065 }
 0x2bb   : > { %809 = vst.msk [vmem:[%s280_s13 + $0x18] sm:$0xff] %vm805_vm2, %v1066_v51 }
 0x2bc PF: > { %s17_s24 = sadd.s32 1, %s1073_s24  }
 0x2bd   : > { %p14_p4 = scmp.ge.s32.totalorder %s17_s24, 4  }
 0x2bf   :  { %16 = sbr.rel (!%p14_p4) target bundleno = 1 (0x1), region = 78 }

</bundles_post_ra>
